<compile_context>
chip_gen: v7x
topology: tpu7x:2x2x1
jax: 0.10.0
libtpu: 0.0.40
codegen_flags: <defaults>
</compile_context>

<pallas_src>
import functools

import jax
import jax.numpy as jnp
from jax.experimental import pallas as pl
from jax.experimental.pallas import tpu as pltpu

_INV_SQRT2 = 0.7071067811865476
_SQRT_2_OVER_PI = 0.7978845608028654


def _gelu(h, approximate):
    if approximate:
        # tanh form -> EUP (otherwise-idle bundle slot); numerics differ slightly.
        return 0.5 * h * (1.0 + jnp.tanh(_SQRT_2_OVER_PI * (h + 0.044715 * h * h * h)))
    # exact GELU (torch.nn.GELU() default): 0.5 * h * (1 + erf(h / sqrt(2)))
    return 0.5 * h * (1.0 + jax.lax.erf(h * _INV_SQRT2))


# ----------------------------------------------------------------------------
# Kernels
# ----------------------------------------------------------------------------
def _ffn_resident_kernel(x_ref, w1_ref, b1_ref, w2_ref, b2_ref, o_ref, *,
                         compute_dtype, approximate_gelu):
    # x_ref: (tm, H)   w1_ref: (H, F)   b1_ref: (1, F) f32
    # w2_ref: (F, H)   b2_ref: (1, H) f32   o_ref: (tm, H)
    x = x_ref[...].astype(compute_dtype)
    h = jnp.dot(x, w1_ref[...], preferred_element_type=jnp.float32) + b1_ref[...]
    g = _gelu(h, approximate_gelu)
    y = jnp.dot(g.astype(compute_dtype), w2_ref[...],
                preferred_element_type=jnp.float32)
    o_ref[...] = (y + b2_ref[...]).astype(o_ref.dtype)


def _ffn_tiled_kernel(x_ref, w1_ref, b1_ref, w2_ref, b2_ref, o_ref,
                      xb_ref, acc_ref, *, compute_dtype, approximate_gelu):
    # Grid: (M-tiles "parallel", F-tiles "arbitrary").
    # x_ref: (tm, H)   w1_ref: (H, tf)   b1_ref: (1, tf) f32
    # w2_ref: (tf, H)  b2_ref: (1, H) f32   o_ref: (tm, H)
    # xb_ref: (tm, H) bf16 scratch   acc_ref: (tm, H) f32 scratch
    k = pl.program_id(1)
    nk = pl.num_programs(1)

    @pl.when(k == 0)
    def _():
        # Hoisted bf16 cast of the x tile: done once per M-tile, reused over k.
        xb_ref[...] = x_ref[...].astype(compute_dtype)
        acc_ref[...] = jnp.zeros_like(acc_ref)

    h = jnp.dot(xb_ref[...], w1_ref[...],
                preferred_element_type=jnp.float32) + b1_ref[...]
    g = _gelu(h, approximate_gelu)
    y = jnp.dot(g.astype(compute_dtype), w2_ref[...],
                preferred_element_type=jnp.float32)

    @pl.when(k < nk - 1)
    def _():
        acc_ref[...] += y

    @pl.when(k == nk - 1)
    def _():
        # Fold the final partial product and bias directly into the output
        # write (avoids an extra (tm, H) f32 accumulator store + re-read).
        o_ref[...] = (acc_ref[...] + y + b2_ref[...]).astype(o_ref.dtype)


# ----------------------------------------------------------------------------
# Wrapper
# ----------------------------------------------------------------------------
def _round_up(x, m):
    return ((x + m - 1) // m) * m


def _cdiv(a, b):
    return -(-a // b)


def _pick_f_tile(F, target, granule=128):
    """Largest multiple of `granule` <= target that divides F, else F itself."""
    if F <= target or F % granule != 0:
        return F
    t = (target // granule) * granule
    while t >= granule:
        if F % t == 0:
            return t
        t -= granule
    return F


def _vmem_budget_bytes():
    """~75% of per-core physical VMEM: ~48 MiB on v7x, ~96 MiB on v5e/v6e."""
    try:
        cap = int(pltpu.get_tpu_info().vmem_capacity_bytes)
    except Exception:
        cap = 64 << 20  # conservative (v7x per-TensorCore)
    return (cap * 3) // 4


@functools.partial(jax.jit, static_argnames=("tm", "tf", "compute_dtype",
                                             "approximate_gelu", "force_tiled"))
def feed_forward_network(x, w1, b1, w2, b2, *, tm=1024, tf=512,
                         compute_dtype=jnp.bfloat16, approximate_gelu=False,
                         force_tiled=False):
    """x: (..., H). w1: (H, F), b1: (F,), w2: (F, H), b2: (H,)."""
    H = x.shape[-1]
    F = w1.shape[1]
    orig_shape = x.shape
    x2d = x.reshape(-1, H)
    M = x2d.shape[0]

    x_isz = x2d.dtype.itemsize
    o_isz = x2d.dtype.itemsize
    w_isz = jnp.dtype(compute_dtype).itemsize
    budget = _vmem_budget_bytes()

    def est_resident(tm_):
        return (2 * tm_ * H * x_isz             # x tiles (double-buffered)
                + 2 * tm_ * H * o_isz           # out tiles (double-buffered)
                + 2 * (H * F + F * H) * w_isz   # W1 + W2 (fetched once; 2x reserved)
                + 2 * (F + H) * 4               # biases
                + tm_ * F * (4 + w_isz))        # h (f32) + gelu (compute dtype)

    def est_tiled(tm_, tf_):
        return (2 * tm_ * H * x_isz
                + tm_ * H * w_isz               # bf16 x scratch
                + 2 * tm_ * H * o_isz
                + tm_ * H * 4                   # f32 accumulator scratch
                + 2 * (H * tf_ + tf_ * H) * w_isz
                + 2 * (tf_ + H) * 4
                + tm_ * tf_ * (4 + w_isz))      # h + gelu intermediates

    # Row tile: large (fills MXU M dim, amortizes per-step overhead), clipped
    # to the padded row count.
    tm_eff = max(8, _round_up(min(tm, _round_up(M, 8)), 8))

    # Prefer the resident-weight path whenever it fits the VMEM budget.
    resident = (not force_tiled) and est_resident(tm_eff) <= budget
    if (not force_tiled) and (not resident):
        t = tm_eff
        while t > 256 and est_resident(t) > budget:
            t = max(256, _round_up(t // 2, 8))
        if est_resident(t) <= budget:
            tm_eff, resident = t, True

    tf_eff = F
    if not resident:
        tf_eff = _pick_f_tile(F, tf)
        while tm_eff > 256 and est_tiled(tm_eff, tf_eff) > budget:
            tm_eff = max(256, _round_up(tm_eff // 2, 8))

    # v7x megacore: prefer >=2 M-tiles for medium/large M so the "parallel"
    # grid axis can shard across both TensorCores (harmless on v5e/v6e).
    if M >= 512 and _cdiv(M, tm_eff) < 2:
        tm_eff = max(8, _round_up(_cdiv(M, 2), 8))

    Mp = _round_up(M, tm_eff)
    if Mp != M:
        x2d = jnp.pad(x2d, ((0, Mp - M), (0, 0)))

    # Cast weights to the MXU compute dtype once (halves weight DMA + VMEM).
    w1c = w1.astype(compute_dtype)
    w2c = w2.astype(compute_dtype)
    b1_2d = b1.reshape(1, F).astype(jnp.float32)
    b2_2d = b2.reshape(1, H).astype(jnp.float32)

    est = est_resident(tm_eff) if resident else est_tiled(tm_eff, tf_eff)
    vmem_limit = int(min(max(int(est * 1.25) + (2 << 20), 32 << 20), budget))

    if resident:
        kernel = functools.partial(_ffn_resident_kernel,
                                   compute_dtype=compute_dtype,
                                   approximate_gelu=approximate_gelu)
        out = pl.pallas_call(
            kernel,
            out_shape=jax.ShapeDtypeStruct((Mp, H), x.dtype),
            grid_spec=pltpu.PrefetchScalarGridSpec(
                num_scalar_prefetch=0,
                grid=(Mp // tm_eff,),
                in_specs=[
                    pl.BlockSpec((tm_eff, H), lambda i: (i, 0)),  # x row tile
                    pl.BlockSpec((H, F), lambda i: (0, 0)),       # W1 (resident)
                    pl.BlockSpec((1, F), lambda i: (0, 0)),       # b1 (resident)
                    pl.BlockSpec((F, H), lambda i: (0, 0)),       # W2 (resident)
                    pl.BlockSpec((1, H), lambda i: (0, 0)),       # b2 (resident)
                ],
                out_specs=pl.BlockSpec((tm_eff, H), lambda i: (i, 0)),
            ),
            compiler_params=pltpu.CompilerParams(
                dimension_semantics=("parallel",),
                vmem_limit_bytes=vmem_limit),
        )(x2d, w1c, b1_2d, w2c, b2_2d)
    else:
        kernel = functools.partial(_ffn_tiled_kernel,
                                   compute_dtype=compute_dtype,
                                   approximate_gelu=approximate_gelu)
        out = pl.pallas_call(
            kernel,
            out_shape=jax.ShapeDtypeStruct((Mp, H), x.dtype),
            grid_spec=pltpu.PrefetchScalarGridSpec(
                num_scalar_prefetch=0,
                grid=(Mp // tm_eff, F // tf_eff),
                in_specs=[
                    pl.BlockSpec((tm_eff, H), lambda i, k: (i, 0)),   # x row tile
                    pl.BlockSpec((H, tf_eff), lambda i, k: (0, k)),   # W1 col tile
                    pl.BlockSpec((1, tf_eff), lambda i, k: (0, k)),   # b1 tile
                    pl.BlockSpec((tf_eff, H), lambda i, k: (k, 0)),   # W2 row tile
                    pl.BlockSpec((1, H), lambda i, k: (0, 0)),        # b2
                ],
                out_specs=pl.BlockSpec((tm_eff, H), lambda i, k: (i, 0)),
                scratch_shapes=[pltpu.VMEM((tm_eff, H), compute_dtype),  # xb
                                pltpu.VMEM((tm_eff, H), jnp.float32)],   # acc
            ),
            compiler_params=pltpu.CompilerParams(
                dimension_semantics=("parallel", "arbitrary"),
                vmem_limit_bytes=vmem_limit),
        )(x2d, w1c, b1_2d, w2c, b2_2d)

    if Mp != M:
        out = out[:M]
    return out.reshape(orig_shape)


def init_params(key, hidden_size, ffn_size, dtype=jnp.float32):
    # Deterministic synthetic init (nn.Linear-like scaling).
    k1, k2, k3, k4 = jax.random.split(key, 4)
    s1 = 1.0 / jnp.sqrt(hidden_size)
    s2 = 1.0 / jnp.sqrt(ffn_size)
    w1 = jax.random.uniform(k1, (hidden_size, ffn_size), dtype, -s1, s1)
    b1 = jax.random.uniform(k2, (ffn_size,), dtype, -s1, s1)
    w2 = jax.random.uniform(k3, (ffn_size, hidden_size), dtype, -s2, s2)
    b2 = jax.random.uniform(k4, (hidden_size,), dtype, -s2, s2)
    return w1, b1, w2, b2


def _reference(x, w1, b1, w2, b2, compute_dtype=jnp.bfloat16):
    """Pure-JAX reference doing the same bf16-matmul / f32-accumulate math."""
    H = x.shape[-1]
    xb = x.reshape(-1, H).astype(compute_dtype)
    h = jnp.dot(xb, w1.astype(compute_dtype),
                preferred_element_type=jnp.float32) + b1
    g = 0.5 * h * (1.0 + jax.lax.erf(h * _INV_SQRT2))
    y = jnp.dot(g.astype(compute_dtype), w2.astype(compute_dtype),
                preferred_element_type=jnp.float32) + b2
    return y.reshape(x.shape).astype(x.dtype)


if __name__ == "__main__":
    key = jax.random.PRNGKey(0)

    # --- Test 1: resident-weight fast path (the common case). ---------------
    batch, seq, hidden, ffn = 2, 8, 32, 64
    kx, kp, key = jax.random.split(key, 3)
    x = jax.random.normal(kx, (batch, seq, hidden), dtype=jnp.float32)
    w1, b1, w2, b2 = init_params(kp, hidden, ffn)

    out = jax.block_until_ready(feed_forward_network(x, w1, b1, w2, b2))
    ref = _reference(x, w1, b1, w2, b2)
    assert out.shape == (batch, seq, hidden)
    assert jnp.allclose(out, ref, atol=2e-2, rtol=2e-2), \
        float(jnp.max(jnp.abs(out - ref)))

    # --- Test 2: tiled-F fallback path (forced; exercises the accumulator). -
    hidden2, ffn2 = 128, 256
    kx2, kp2 = jax.random.split(key)
    x2 = jax.random.normal(kx2, (batch, seq, hidden2), dtype=jnp.float32)
    p2 = init_params(kp2, hidden2, ffn2)

    out2 = jax.block_until_ready(
        feed_forward_network(x2, *p2, tf=128, force_tiled=True))
    ref2 = _reference(x2, *p2)
    assert out2.shape == (batch, seq, hidden2)
    assert jnp.allclose(out2, ref2, atol=2e-2, rtol=2e-2), \
        float(jnp.max(jnp.abs(out2 - ref2)))

    print("KERNEL_OK")
</pallas_src>

<mosaic_0001>
module attributes {stable_mosaic.version = 11 : i64} {
  func.func @_ffn_resident_kernel(%arg0: i32, %arg1: memref<16x32xf32, #tpu.memory_space<vmem>>, %arg2: memref<32x64xbf16, #tpu.memory_space<vmem>>, %arg3: memref<1x64xf32, #tpu.memory_space<vmem>>, %arg4: memref<64x32xbf16, #tpu.memory_space<vmem>>, %arg5: memref<1x32xf32, #tpu.memory_space<vmem>>, %arg6: memref<16x32xf32, #tpu.memory_space<vmem>>) attributes {dimension_semantics = [#tpu.dimension_semantics<parallel>], iteration_bounds = array<i64: 1>, scalar_prefetch = 0 : i64, scratch_operands = 0 : i64, tpu.core_type = #tpu.core_type<tc>, window_params = [{transform_indices = @transform_0, window_bounds = array<i64: 16, 32>}, {pipeline_mode = #tpu.pipeline_mode<synchronous>, transform_indices = @transform_1, window_bounds = array<i64: 32, 64>}, {pipeline_mode = #tpu.pipeline_mode<synchronous>, transform_indices = @transform_2, window_bounds = array<i64: 1, 64>}, {pipeline_mode = #tpu.pipeline_mode<synchronous>, transform_indices = @transform_3, window_bounds = array<i64: 64, 32>}, {pipeline_mode = #tpu.pipeline_mode<synchronous>, transform_indices = @transform_4, window_bounds = array<i64: 1, 32>}, {transform_indices = @transform_5, window_bounds = array<i64: 16, 32>}]} {
    %c0 = arith.constant 0 : index
    %c0_0 = arith.constant 0 : index
    %0 = vector.load %arg1[%c0, %c0_0] : memref<16x32xf32, #tpu.memory_space<vmem>>, vector<16x32xf32>
    %1 = arith.truncf %0 : vector<16x32xf32> to vector<16x32xbf16>
    %c0_1 = arith.constant 0 : index
    %c0_2 = arith.constant 0 : index
    %2 = vector.load %arg2[%c0_1, %c0_2] : memref<32x64xbf16, #tpu.memory_space<vmem>>, vector<32x64xbf16>
    %cst = arith.constant dense<0.000000e+00> : vector<16x64xf32>
    %3 = tpu.matmul %1, %2, %cst {dimension_numbers = #tpu.dot_dimension_numbers<[1], [0], [0], [1], [0, 0, 1, 1], [], []>} : vector<16x32xbf16>, vector<32x64xbf16>, vector<16x64xf32> -> vector<16x64xf32>
    %c0_3 = arith.constant 0 : index
    %c0_4 = arith.constant 0 : index
    %4 = vector.load %arg3[%c0_3, %c0_4] : memref<1x64xf32, #tpu.memory_space<vmem>>, vector<1x64xf32>
    %5 = vector.broadcast %4 : vector<1x64xf32> to vector<16x64xf32>
    %6 = arith.addf %3, %5 : vector<16x64xf32>
    %cst_5 = arith.constant 5.000000e-01 : f32
    %7 = vector.broadcast %cst_5 : f32 to vector<16x64xf32>
    %8 = arith.mulf %7, %6 : vector<16x64xf32>
    %cst_6 = arith.constant 0.707106769 : f32
    %9 = vector.broadcast %cst_6 : f32 to vector<16x64xf32>
    %10 = arith.mulf %6, %9 : vector<16x64xf32>
    %11 = math.erf %10 : vector<16x64xf32>
    %cst_7 = arith.constant 1.000000e+00 : f32
    %12 = vector.broadcast %cst_7 : f32 to vector<16x64xf32>
    %13 = arith.addf %12, %11 : vector<16x64xf32>
    %14 = arith.mulf %8, %13 : vector<16x64xf32>
    %15 = arith.truncf %14 : vector<16x64xf32> to vector<16x64xbf16>
    %c0_8 = arith.constant 0 : index
    %c0_9 = arith.constant 0 : index
    %16 = vector.load %arg4[%c0_8, %c0_9] : memref<64x32xbf16, #tpu.memory_space<vmem>>, vector<64x32xbf16>
    %cst_10 = arith.constant dense<0.000000e+00> : vector<16x32xf32>
    %17 = tpu.matmul %15, %16, %cst_10 {dimension_numbers = #tpu.dot_dimension_numbers<[1], [0], [0], [1], [0, 0, 1, 1], [], []>} : vector<16x64xbf16>, vector<64x32xbf16>, vector<16x32xf32> -> vector<16x32xf32>
    %c0_11 = arith.constant 0 : index
    %c0_12 = arith.constant 0 : index
    %18 = vector.load %arg5[%c0_11, %c0_12] : memref<1x32xf32, #tpu.memory_space<vmem>>, vector<1x32xf32>
    %19 = vector.broadcast %18 : vector<1x32xf32> to vector<16x32xf32>
    %20 = arith.addf %17, %19 : vector<16x32xf32>
    %c0_13 = arith.constant 0 : index
    %c0_14 = arith.constant 0 : index
    %21 = vector.load %arg6[%c0_13, %c0_14] : memref<16x32xf32, #tpu.memory_space<vmem>>, vector<16x32xf32>
    tpu.vector_store %arg6[%c0_13, %c0_14], %20 {strides = array<i32>} : memref<16x32xf32, #tpu.memory_space<vmem>>, vector<16x32xf32>,
    return
  }
  func.func @transform_0(%arg0: i32) -> (i32, i32) {
    %c0_i32 = arith.constant 0 : i32
    %c0_i32_0 = arith.constant 0 : i32
    return %arg0, %c0_i32 : i32, i32
  }
  func.func @transform_1(%arg0: i32) -> (i32, i32) {
    %c0_i32 = arith.constant 0 : i32
    %c0_i32_0 = arith.constant 0 : i32
    %c0_i32_1 = arith.constant 0 : i32
    return %c0_i32, %c0_i32_0 : i32, i32
  }
  func.func @transform_2(%arg0: i32) -> (i32, i32) {
    %c0_i32 = arith.constant 0 : i32
    %c0_i32_0 = arith.constant 0 : i32
    %c0_i32_1 = arith.constant 0 : i32
    return %c0_i32, %c0_i32_0 : i32, i32
  }
  func.func @transform_3(%arg0: i32) -> (i32, i32) {
    %c0_i32 = arith.constant 0 : i32
    %c0_i32_0 = arith.constant 0 : i32
    %c0_i32_1 = arith.constant 0 : i32
    return %c0_i32, %c0_i32_0 : i32, i32
  }
  func.func @transform_4(%arg0: i32) -> (i32, i32) {
    %c0_i32 = arith.constant 0 : i32
    %c0_i32_0 = arith.constant 0 : i32
    %c0_i32_1 = arith.constant 0 : i32
    return %c0_i32, %c0_i32_0 : i32, i32
  }
  func.func @transform_5(%arg0: i32) -> (i32, i32) {
    %c0_i32 = arith.constant 0 : i32
    %c0_i32_0 = arith.constant 0 : i32
    return %arg0, %c0_i32 : i32, i32
  }
}

</mosaic_0001>

<bundles_post_ra>
// kernel: feed_forward_network.1
= control target key start
LH: loop header
LB: loop body
LE: loop exit
PB: predicated region body
PF: predicated region fallthrough
CT: control target
= control target key end

     0   :  { %v283_v1 = vmov 0.0   ;;  %vm284_vm0 = vmmov 0   ;;  %s363_s0 = inlined_call_operand.vmem [shape: f32[16,32], index: 0, kind: input, shape index: {}]   ;;  %s364_s1 = inlined_call_operand.vmem [shape: bf16[32,64], index: 1, kind: input, shape index: {}]   ;;  %s365_s2 = inlined_call_operand.vmem [shape: f32[1,64], index: 2, kind: input, shape index: {}]   ;;  %s366_s3 = inlined_call_operand.vmem [shape: bf16[64,32], index: 3, kind: input, shape index: {}]   ;;  %s367_s4 = inlined_call_operand.vmem [shape: f32[1,32], index: 4, kind: input, shape index: {}]   ;;  %s368_s5 = inlined_call_operand.hbm [shape: f32[16,32], index: 5, kind: output, shape index: {}]  }
   0x1   :  { %v249_v0 = vld [vmem:[%s364_s1] sm:$0xff]   ;;  %224 = vmatprep.subr.bf16.mxu0 %v283_v1  ;;  %232 = vmatprep.subr.bf16.mxu1 %v283_v1  ;;  %v250_v2 = vld [vmem:[%s364_s1 + $0x8] sm:$0xff]  }
   0x2   :  { %225 = vmatpush3.bf16.msra.mxu0 %v249_v0  ;;  %228 = vmatprep.mubr.msk.bf16.mxu0 %vm284_vm0, %v283_v1  ;;  %v22_v3 = vld [vmem:[%s363_s0] sm:$0xff]  ;;  %v23_v4 = vld [vmem:[%s363_s0 + $0x8] sm:$0xff] }
   0x3   :  { %226 = vmatprep.subr.bf16.mxu0 %v283_v1  ;;  %240 = vmatprep.mubr.msk.bf16.mxu1 %vm284_vm0, %v283_v1  ;;  %v24_v5 = vpack.c.bf16 %v23_v4, %v22_v3 }
   0x4   :  { %10 = vsyncpa [#allocation3], 0  ;;  %vm48_vm1 = vcmask 261120   ;;  %v251_v6 = vld [vmem:[%s366_s3] sm:$0xff]   ;;  %v252_v7 = vld [vmem:[%s366_s3 + $0x8] sm:$0xff]   ;;  %vm143_vm2 = vcmask 523264  }
   0x5   :  { %233 = vmatpush3.bf16.msra.mxu1 %v251_v6  ;;  %v253_v8 = vld [vmem:[%s366_s3 + $0x10] sm:$0xff]   ;;  %v254_v9 = vld [vmem:[%s366_s3 + $0x18] sm:$0xff]   ;;  %v206_v10 = vld [vmem:[%s365_s2] ss:$0 sm:$0xff]  ;;  %s285_s9 = smov [#allocation2]  }
   0x6   :  { %227 = vmatpush3.bf16.msra.mxu0 %v250_v2  ;;  %234 = vmatprep.subr.bf16.mxu1 %v283_v1  ;;  %v210_v28 = vld [vmem:[%s367_s4] ss:$0 sm:$0xff]  ;;  %s195_s10 = sshll.u32 %s285_s9, 4  ;;  %s196_s10 = int_to_ptr.vmem [resolvable:$true] %s195_s10 }
   0x7   :  { %s259_s11 = scalar_lea.vmem %s196_s10, 256  ;;  %p264_p1 = scmp.lt.s32.totalorder %s196_s10, %s196_s10 }
   0x8   :  { %p260_p0 = scmp.ne.s32.totalorder %s196_s10, %s259_s11  ;;  %p265_p2 = scmp.lt.s32.totalorder %s259_s11, %s259_s11 }
   0x9   :  { %229 = vmatmul.mubr.msk.bf16.vlgmr.msra.gmra.mrb[0].mxu0 %vm48_vm1, %v24_v5  ;;  %235 = vmatpush3.bf16.msra.mxu1 %v252_v7 }
   0xa   :  { %236 = vmatprep.subr.bf16.mxu1 %v283_v1  ;;  %p266_p3 = por %p265_p2, %p264_p1 }
   0xc   :  { %p267_p4 = pnand %p266_p3, %p260_p0 }
   0xd   :  { %237 = vmatpush3.bf16.msra.mxu1 %v253_v8 }
   0xe   :  { %238 = vmatprep.subr.bf16.mxu1 %v283_v1 }
  0x11   :  { %239 = vmatpush3.bf16.msra.mxu1 %v254_v9 }
  0xdc   :  { %v86_v11 = vpop.f32.mrb[0].mxu0 }
  0xdd   :  { %v87_v12 = vadd.f32 %v206_v10, %v86_v11  ;;  %v230_v13 = vpop.f32.mrb[1].mxu0 }
  0xde   :  { %v89_v14 = vpop.f32.mrb[2].mxu0 }
  0xdf   :  { %v95_v15 = vmul.f32 0.70710677, %v87_v12  ;;  %v90_v16 = vadd.f32 %v206_v10, %v89_v14  ;;  %v231_v17 = vpop.f32.mrb[3].mxu0  ;;  %v93_v22 = vmul.f32 0.5, %v87_v12 }
  0xe1   :  { %255 = verf.f32 %v95_v15  ;;  %v96_v18 = vmul.f32 0.70710677, %v90_v16  ;;  %v94_v23 = vmul.f32 0.5, %v90_v16 }
  0xe3   :  { %257 = verf.f32 %v96_v18 }
  0xeb   :  { %v256_v19 = vpop.eup %255 }
  0xec   :  { %v99_v20 = vadd.f32 1.0, %v256_v19 }
  0xed   :  { %v258_v21 = vpop.eup %257 }
  0xee   :  { %v100_v24 = vadd.f32 1.0, %v258_v21  ;;  %v101_v25 = vmul.f32 %v99_v20, %v93_v22 }
  0xf0   :  { %v102_v26 = vmul.f32 %v100_v24, %v94_v23 }
  0xf2   :  { %v103_v27 = vpack.c.bf16 %v102_v26, %v101_v25 }
  0xf4   :  { %241 = vmatmul.mubr.msk.bf16.vlgmr.msra.gmra.mrb[0].mxu1 %vm143_vm2, %v103_v27 }
 0x1c7   :  { %v181_v29 = vpop.f32.mrb[0].mxu1 }
 0x1c8   :  { %v182_v30 = vadd.f32 %v210_v28, %v181_v29  ;;  %v242_v31 = vpop.f32.mrb[1].mxu1 }
 0x1c9   :  { %v184_v32 = vpop.f32.mrb[2].mxu1 }
 0x1ca   :  { %188 = vst.msk [vmem:[#allocation2] sm:$0xff] %vm48_vm1, %v182_v30  ;;  %v185_v33 = vadd.f32 %v210_v28, %v184_v32  ;;  %v243_v34 = vpop.f32.mrb[3].mxu1 }
 0x1cc   :  { %189 = vst.msk [vmem:[#allocation2 + $0x8] sm:$0xff] %vm48_vm1, %v185_v33 }
 0x1cd   :  { %270 = shalt.err (!%p267_p4)
}
 0x1ce   :  { %s271_s13 = scalar_lea.hbm %s368_s5, 256 }
 0x1cf   :  { %p272_p5 = scmp.ne.s32.totalorder %s368_s5, %s271_s13  ;;  %p275_p6 = scmp.lt.u32.totalorder %s271_s13, %s368_s5 }
 0x1d1   :  { %p277_p7 = pnand %p275_p6, %p272_p5 }
 0x1d3   :  { %280 = shalt.err (!%p277_p7)
}
 0x1d4   :  { %s286_s18 = smov 128   ;;  %s287_s19 = smov 8  }
 0x1d5   :  { %201 = dma.vmem_to_hbm [thread:$0]  %s196_s10, 256, %s368_s5, [#allocation3], %s286_s18, %s286_s18, %s287_s19  }
 0x1d6   :  { %281 = dma.done.wait [#allocation3], 256  }
 0x1d7   :  { %282 = vsyncadd [#allocation3], 4294967040 }
 0x1d8   :  { %205 = vsyncpa [#allocation3], 1 }

</bundles_post_ra>
